<compile_context>
chip_gen: v6e
topology: v6e:2x2x1
jax: 0.10.0
libtpu: 0.0.40
codegen_flags: <defaults>
</compile_context>

<pallas_src>
import functools

import numpy as np
import jax
import jax.numpy as jnp
from jax.experimental import pallas as pl
from jax.experimental.pallas import tpu as pltpu

# ----------------------------- hyperparameters ------------------------------
IN_SIZE = 16          # number of nodes in the input network
DIM = 32              # per-head dimension  (gat_shapes["dimension"])
HEADS = 2             # gat_shapes["n_heads"]
N_LAYERS = 2          # gat_shapes["n_layers"]  -> number of sampled adjs
ALPHA = 0.1           # LeakyReLU negative slope
HC = DIM * HEADS      # 64 = hidden width
LANES = 128           # vreg / MXU lane width; wbig is zero-padded to this
A_ROWS = 8            # sublane padding for the transposed att_l matrix


# ------------------------------ Pallas kernel -------------------------------
def _encoder_kernel(*refs, heads, dim, dst_sizes, neg_slope):
    """Fused GATEncoder forward. x stays resident in VMEM across layers.

    refs = (x0, pre_b, wbig, alt, gat_b, ew_0, ..., ew_{L-1}, out, xacc)
      x0    : [N0, HC]       pre_gat.weight.T[n_id] (gathered rows, no bias)
      pre_b : [1, HC]        pre_gat bias
      wbig  : [HC, 128]      [ W_l | aR | 0-pad ], aR[:,h] = W_r[:,hD:(h+1)D]@att_r[h]
      alt   : [8, HC]        rows 0..H-1 = (W_l[:,hD:(h+1)D]@att_l[h]).T, rest 0
      gat_b : [1, HC]        GAT output bias
      ew_j  : [Ndst_j, Nsrc_j]  dense edge weights (self loops = 1.0, 0 = no edge)
      out   : [Ndst_last, HC]
      xacc  : [N0, HC]       VMEM scratch — per-head lane-slice accumulator
    """
    n_layers = len(dst_sizes)
    hc = heads * dim
    x0_ref, pre_b_ref, wbig_ref, alt_ref, gat_b_ref = refs[:5]
    ew_refs = refs[5:5 + n_layers]
    out_ref = refs[5 + n_layers]
    xacc_ref = refs[6 + n_layers]

    wbig = wbig_ref[...]                      # [HC, 128]
    alt = alt_ref[...]                        # [8, HC]
    gat_b = gat_b_ref[...]                    # [1, HC]

    # pre_gat projection (row gather done in the wrapper, bias added here)
    x = x0_ref[...] + pre_b_ref[...]

    store = []
    for j in range(n_layers):                 # static unroll over layers
        n_dst = dst_sizes[j]
        if j != 0:
            store = [s[:n_dst] for s in store]
            store.append(x[:n_dst])

        ew = ew_refs[j][...]                  # [n_dst, n_src]
        adj = ew > 0.0                        # mask derived in-kernel (w > 0)

        # Fused MXU matmul (128-lane aligned): xl at lanes 0..HC-1,
        # folded destination logits a_dst at lanes HC..HC+H-1.
        y = jnp.dot(x, wbig, preferred_element_type=jnp.float32)   # [n_src, 128]
        xl = y[:, :hc]                                             # [n_src, HC]

        # Per-source logits directly as ROWS via one tiny MXU matmul
        # (replaces the masked-diagonal relayout): [8, n_src], rows 0..H-1 used.
        a_src_rows = jax.lax.dot_general(
            alt, x, (((1,), (1,)), ((), ())),
            preferred_element_type=jnp.float32)

        for h in range(heads):                # static, tiny loop
            a_dst_col = y[:n_dst, hc + h:hc + h + 1]               # [n_dst, 1]
            a_src_row = a_src_rows[h:h + 1, :]                     # [1, n_src]

            # attention logits: e[i, j] = a_dst[i] + a_src[j]
            e = a_dst_col + a_src_row                              # [n_dst, n_src]
            e = jnp.where(e > 0, e, neg_slope * e)                 # LeakyReLU
            e = jnp.where(adj, e, -1e30)                           # mask non-edges

            # per-destination (segment) softmax; every dst row has a self-loop
            # so the denominator is >= 1 and masked exp underflows to 0.
            m = jnp.max(e, axis=-1, keepdims=True)
            p = jnp.exp(e - m)
            s = jnp.sum(p, axis=-1, keepdims=True)
            attn = p * pl.reciprocal(s, approx=True)

            # messages scaled by edge weights, aggregated per destination (MXU);
            # head output written straight into its lane slice of the scratch.
            coef = attn * ew
            xacc_ref[0:n_dst, h * dim:(h + 1) * dim] = jnp.dot(
                coef, xl[:, h * dim:(h + 1) * dim],
                preferred_element_type=jnp.float32)

        x = xacc_ref[0:n_dst, :] + gat_b                           # [n_dst, HC]

    out_ref[...] = x if not store else sum(store) + x


def gat_encoder_forward(n_id, adjs, p):
    """Mirrors GATEncoder.forward over a list of (mask, edge_weight, size)."""
    n_layers = len(adjs)
    dst_sizes = tuple(int(adj[2][1]) for adj in adjs)

    # pre_gat row gather (index-select). Plain XLA gather in the wrapper;
    # everything downstream is fused into one kernel.
    # TODO(synk): could move in-kernel via scalar-prefetch DMA gather at scale.
    x0 = p["pre_w"].T[n_id]                                   # [N0, HC]
    n0 = int(x0.shape[0])

    # Fold attention vectors into the projections:
    #   aL[:, h] = W_l[:, hD:(h+1)D] @ att_l[h],  aR analogous with W_r.
    wl3 = p["w_l"].reshape(HC, HEADS, DIM)
    wr3 = p["w_r"].reshape(HC, HEADS, DIM)
    aL = jnp.einsum("chd,hd->ch", wl3, p["att_l"])            # [HC, H]
    aR = jnp.einsum("chd,hd->ch", wr3, p["att_r"])            # [HC, H]

    # wbig zero-padded to 128 output lanes: [ W_l | aR | 0 ].
    pad = jnp.zeros((HC, LANES - HC - HEADS), jnp.float32)
    wbig = jnp.concatenate([p["w_l"], aR, pad], axis=1)       # [HC, 128]

    # att_l pre-transposed + sublane-padded: rows 0..H-1 = aL.T, rest zero.
    alt = jnp.zeros((A_ROWS, HC), jnp.float32).at[:HEADS].set(aL.T)

    ews = [adj[1] for adj in adjs]                            # kernel only needs weights

    kernel = functools.partial(_encoder_kernel, heads=HEADS, dim=DIM,
                               dst_sizes=dst_sizes, neg_slope=ALPHA)
    vmem = pl.BlockSpec(memory_space=pltpu.MemorySpace.VMEM)
    return pl.pallas_call(
        kernel,
        out_shape=jax.ShapeDtypeStruct((dst_sizes[-1], HC), jnp.float32),
        in_specs=[vmem] * (5 + n_layers),
        out_specs=vmem,
        scratch_shapes=[pltpu.VMEM((n0, HC), jnp.float32)],
    )(x0,
      p["pre_b"].reshape(1, HC),
      wbig,
      alt,
      p["gat_bias"].reshape(1, HC),
      *ews)


# ------------------------- pure-JAX reference (check) -----------------------
def _gat_conv_ref(x_src, x_dst, mask, ew, p):
    n_src, n_dst = x_src.shape[0], x_dst.shape[0]
    xl = (x_src @ p["w_l"]).reshape(n_src, HEADS, DIM)
    xr = (x_dst @ p["w_r"]).reshape(n_dst, HEADS, DIM)
    a_src = (xl * p["att_l"][None]).sum(-1)                   # [N_src, H]
    a_dst = (xr * p["att_r"][None]).sum(-1)                   # [N_dst, H]
    e = a_dst[:, None, :] + a_src[None, :, :]                 # [N_dst, N_src, H]
    e = jnp.where(e > 0, e, ALPHA * e)
    e = jnp.where(mask[..., None] > 0, e, -1e30)
    m = e.max(axis=1, keepdims=True)
    pm = jnp.exp(e - m) * mask[..., None]
    attn = pm / pm.sum(axis=1, keepdims=True)
    coef = attn * ew[..., None]
    out = jnp.einsum("ijh,jhc->ihc", coef, xl).reshape(n_dst, HC)
    return out + p["gat_bias"]


def gat_encoder_forward_ref(n_id, adjs, p):
    x_store_layer = []
    x = None
    for j, (mask, ew, size) in enumerate(adjs):
        if j == 0:
            x = p["pre_w"].T[n_id] + p["pre_b"]
        if j != 0:
            x_store_layer = [xs[: size[1]] for xs in x_store_layer]
            x_store_layer.append(x[: size[1]])
        x = _gat_conv_ref(x, x[: size[1]], mask, ew, p)
    return sum(x_store_layer) + x


# ------------------------------- input setup --------------------------------
def build_dense_adj(src, dst, w, size):
    """Edge list -> dense [N_dst, N_src] mask + weights, PyG-style self loops.

    Glue (plain numpy): sparse scatter/gather from edge_index has no clean
    Pallas-TPU equivalent at this scale, so the graph is densified here and
    the masked segment-softmax happens inside the kernel.
    """
    n_src, n_dst = size
    mask = np.zeros((n_dst, n_src), np.float32)
    ew = np.zeros((n_dst, n_src), np.float32)
    for s, d, ww in zip(src, dst, w):
        if s == d:            # remove_self_loops
            continue
        mask[d, s] = 1.0
        ew[d, s] = float(ww)
    for i in range(min(n_src, n_dst)):   # add_self_loops, fill weight 1.0
        mask[i, i] = 1.0
        ew[i, i] = 1.0
    return jnp.asarray(mask), jnp.asarray(ew)


def make_random_adj(key, n_src, n_dst, n_edges):
    k1, k2, k3 = jax.random.split(key, 3)
    src = np.asarray(jax.random.randint(k1, (n_edges,), 0, n_src))
    dst = np.asarray(jax.random.randint(k2, (n_edges,), 0, n_dst))
    w = np.asarray(jax.random.uniform(k3, (n_edges,), minval=0.1, maxval=1.0))
    mask, ew = build_dense_adj(src, dst, w, (n_src, n_dst))
    return mask, ew, (n_src, n_dst)


def init_params(key):
    ks = jax.random.split(key, 7)
    f = lambda k, shape: (0.1 * jax.random.normal(k, shape)).astype(jnp.float32)
    return {
        "pre_w": f(ks[0], (HC, IN_SIZE)),     # nn.Linear(in_size, HC).weight
        "pre_b": f(ks[1], (HC,)),
        "w_l": f(ks[2], (HC, HC)),            # lin_src weight (transposed)
        "w_r": f(ks[3], (HC, HC)),            # lin_dst weight (transposed)
        "att_l": f(ks[4], (HEADS, DIM)),
        "att_r": f(ks[5], (HEADS, DIM)),
        "gat_bias": f(ks[6], (HC,)),
    }


if __name__ == "__main__":
    root = jax.random.PRNGKey(0)
    k_param, k_adj0, k_adj1 = jax.random.split(root, 3)

    params = init_params(k_param)
    n_id = jnp.arange(IN_SIZE, dtype=jnp.int32)
    adjs = [
        make_random_adj(k_adj0, IN_SIZE, IN_SIZE, 48),
        make_random_adj(k_adj1, IN_SIZE, IN_SIZE, 48),
    ][:N_LAYERS]

    out = jax.block_until_ready(gat_encoder_forward(n_id, adjs, params))
    ref = jax.block_until_ready(gat_encoder_forward_ref(n_id, adjs, params))

    assert out.shape == (IN_SIZE, HC), out.shape
    np.testing.assert_allclose(np.asarray(out), np.asarray(ref),
                               rtol=1e-2, atol=1e-2)
    print("KERNEL_OK")
</pallas_src>

<mosaic_0001>
module attributes {stable_mosaic.version = 11 : i64} {
  func.func @_encoder_kernel(%arg0: memref<16x64xf32, #tpu.memory_space<vmem>>, %arg1: memref<1x64xf32, #tpu.memory_space<vmem>>, %arg2: memref<64x128xf32, #tpu.memory_space<vmem>>, %arg3: memref<8x64xf32, #tpu.memory_space<vmem>>, %arg4: memref<1x64xf32, #tpu.memory_space<vmem>>, %arg5: memref<16x16xf32, #tpu.memory_space<vmem>>, %arg6: memref<16x16xf32, #tpu.memory_space<vmem>>, %arg7: memref<16x64xf32, #tpu.memory_space<vmem>>, %arg8: memref<16x64xf32, #tpu.memory_space<vmem>>) attributes {dimension_semantics = [], scalar_prefetch = 0 : i64, scratch_operands = 1 : i64, tpu.core_type = #tpu.core_type<tc>} {
    %c0 = arith.constant 0 : index
    %c0_0 = arith.constant 0 : index
    %0 = vector.load %arg2[%c0, %c0_0] : memref<64x128xf32, #tpu.memory_space<vmem>>, vector<64x128xf32>
    %c0_1 = arith.constant 0 : index
    %c0_2 = arith.constant 0 : index
    %1 = vector.load %arg3[%c0_1, %c0_2] : memref<8x64xf32, #tpu.memory_space<vmem>>, vector<8x64xf32>
    %c0_3 = arith.constant 0 : index
    %c0_4 = arith.constant 0 : index
    %2 = vector.load %arg4[%c0_3, %c0_4] : memref<1x64xf32, #tpu.memory_space<vmem>>, vector<1x64xf32>
    %c0_5 = arith.constant 0 : index
    %c0_6 = arith.constant 0 : index
    %3 = vector.load %arg0[%c0_5, %c0_6] : memref<16x64xf32, #tpu.memory_space<vmem>>, vector<16x64xf32>
    %c0_7 = arith.constant 0 : index
    %c0_8 = arith.constant 0 : index
    %4 = vector.load %arg1[%c0_7, %c0_8] : memref<1x64xf32, #tpu.memory_space<vmem>>, vector<1x64xf32>
    %5 = vector.broadcast %4 : vector<1x64xf32> to vector<16x64xf32>
    %6 = arith.addf %3, %5 : vector<16x64xf32>
    %c0_9 = arith.constant 0 : index
    %c0_10 = arith.constant 0 : index
    %7 = vector.load %arg5[%c0_9, %c0_10] : memref<16x16xf32, #tpu.memory_space<vmem>>, vector<16x16xf32>
    %cst = arith.constant 0.000000e+00 : f32
    %8 = vector.broadcast %cst : f32 to vector<16x16xf32>
    %9 = arith.cmpf ogt, %7, %8 : vector<16x16xf32>
    %cst_11 = arith.constant dense<0.000000e+00> : vector<16x128xf32>
    %10 = tpu.matmul %6, %0, %cst_11 {dimension_numbers = #tpu.dot_dimension_numbers<[1], [0], [0], [1], [0, 0, 1, 1], [], []>} : vector<16x64xf32>, vector<64x128xf32>, vector<16x128xf32> -> vector<16x128xf32>
    %11 = vector.extract_strided_slice %10 {offsets = [0, 0], sizes = [16, 64], strides = [1, 1]} : vector<16x128xf32> to vector<16x64xf32>
    %cst_12 = arith.constant dense<0.000000e+00> : vector<8x16xf32>
    %12 = tpu.matmul %1, %6, %cst_12 {dimension_numbers = #tpu.dot_dimension_numbers<[1], [1], [0], [0], [0, 0, 1, 0], [], []>} : vector<8x64xf32>, vector<16x64xf32>, vector<8x16xf32> -> vector<8x16xf32>
    %13 = vector.extract_strided_slice %10 {offsets = [0, 64], sizes = [16, 1], strides = [1, 1]} : vector<16x128xf32> to vector<16x1xf32>
    %14 = vector.extract_strided_slice %12 {offsets = [0, 0], sizes = [1, 16], strides = [1, 1]} : vector<8x16xf32> to vector<1x16xf32>
    %15 = vector.broadcast %13 : vector<16x1xf32> to vector<16x16xf32>
    %16 = vector.broadcast %14 : vector<1x16xf32> to vector<16x16xf32>
    %17 = arith.addf %15, %16 : vector<16x16xf32>
    %cst_13 = arith.constant 0.000000e+00 : f32
    %18 = vector.broadcast %cst_13 : f32 to vector<16x16xf32>
    %19 = arith.cmpf ogt, %17, %18 : vector<16x16xf32>
    %cst_14 = arith.constant 1.000000e-01 : f32
    %20 = vector.broadcast %cst_14 : f32 to vector<16x16xf32>
    %21 = arith.mulf %20, %17 : vector<16x16xf32>
    %22 = arith.select %19, %17, %21 : vector<16x16xi1>, vector<16x16xf32>
    %cst_15 = arith.constant -1.000000e+30 : f32
    %23 = vector.broadcast %cst_15 : f32 to vector<16x16xf32>
    %24 = arith.select %9, %22, %23 : vector<16x16xi1>, vector<16x16xf32>
    %cst_16 = arith.constant dense<0xFF800000> : vector<16xf32>
    %25 = vector.multi_reduction <maximumf>, %24, %cst_16 [1] : vector<16x16xf32> to vector<16xf32>
    %26 = vector.shape_cast %25 : vector<16xf32> to vector<16x1xf32>
    %27 = vector.broadcast %26 : vector<16x1xf32> to vector<16x16xf32>
    %28 = arith.subf %24, %27 : vector<16x16xf32>
    %29 = math.exp %28 : vector<16x16xf32>
    %cst_17 = arith.constant dense<0.000000e+00> : vector<16xf32>
    %30 = vector.multi_reduction <add>, %29, %cst_17 [1] : vector<16x16xf32> to vector<16xf32>
    %31 = vector.shape_cast %30 : vector<16xf32> to vector<16x1xf32>
    %32 = tpu.reciprocal %31 {approx = true} : vector<16x1xf32> -> vector<16x1xf32>
    %33 = vector.broadcast %32 : vector<16x1xf32> to vector<16x16xf32>
    %34 = arith.mulf %29, %33 : vector<16x16xf32>
    %35 = arith.mulf %34, %7 : vector<16x16xf32>
    %36 = vector.extract_strided_slice %11 {offsets = [0, 0], sizes = [16, 32], strides = [1, 1]} : vector<16x64xf32> to vector<16x32xf32>
    %cst_18 = arith.constant dense<0.000000e+00> : vector<16x32xf32>
    %37 = tpu.matmul %35, %36, %cst_18 {dimension_numbers = #tpu.dot_dimension_numbers<[1], [0], [0], [1], [0, 0, 1, 1], [], []>} : vector<16x16xf32>, vector<16x32xf32>, vector<16x32xf32> -> vector<16x32xf32>
    %c0_19 = arith.constant 0 : index
    %c0_20 = arith.constant 0 : index
    %38 = vector.load %arg8[%c0_19, %c0_20] : memref<16x64xf32, #tpu.memory_space<vmem>>, vector<16x32xf32>
    tpu.vector_store %arg8[%c0_19, %c0_20], %37 {strides = array<i32>} : memref<16x64xf32, #tpu.memory_space<vmem>>, vector<16x32xf32>,
    %39 = vector.extract_strided_slice %10 {offsets = [0, 65], sizes = [16, 1], strides = [1, 1]} : vector<16x128xf32> to vector<16x1xf32>
    %40 = vector.extract_strided_slice %12 {offsets = [1, 0], sizes = [1, 16], strides = [1, 1]} : vector<8x16xf32> to vector<1x16xf32>
    %41 = vector.broadcast %39 : vector<16x1xf32> to vector<16x16xf32>
    %42 = vector.broadcast %40 : vector<1x16xf32> to vector<16x16xf32>
    %43 = arith.addf %41, %42 : vector<16x16xf32>
    %cst_21 = arith.constant 0.000000e+00 : f32
    %44 = vector.broadcast %cst_21 : f32 to vector<16x16xf32>
    %45 = arith.cmpf ogt, %43, %44 : vector<16x16xf32>
    %cst_22 = arith.constant 1.000000e-01 : f32
    %46 = vector.broadcast %cst_22 : f32 to vector<16x16xf32>
    %47 = arith.mulf %46, %43 : vector<16x16xf32>
    %48 = arith.select %45, %43, %47 : vector<16x16xi1>, vector<16x16xf32>
    %cst_23 = arith.constant -1.000000e+30 : f32
    %49 = vector.broadcast %cst_23 : f32 to vector<16x16xf32>
    %50 = arith.select %9, %48, %49 : vector<16x16xi1>, vector<16x16xf32>
    %cst_24 = arith.constant dense<0xFF800000> : vector<16xf32>
    %51 = vector.multi_reduction <maximumf>, %50, %cst_24 [1] : vector<16x16xf32> to vector<16xf32>
    %52 = vector.shape_cast %51 : vector<16xf32> to vector<16x1xf32>
    %53 = vector.broadcast %52 : vector<16x1xf32> to vector<16x16xf32>
    %54 = arith.subf %50, %53 : vector<16x16xf32>
    %55 = math.exp %54 : vector<16x16xf32>
    %cst_25 = arith.constant dense<0.000000e+00> : vector<16xf32>
    %56 = vector.multi_reduction <add>, %55, %cst_25 [1] : vector<16x16xf32> to vector<16xf32>
    %57 = vector.shape_cast %56 : vector<16xf32> to vector<16x1xf32>
    %58 = tpu.reciprocal %57 {approx = true} : vector<16x1xf32> -> vector<16x1xf32>
    %59 = vector.broadcast %58 : vector<16x1xf32> to vector<16x16xf32>
    %60 = arith.mulf %55, %59 : vector<16x16xf32>
    %61 = arith.mulf %60, %7 : vector<16x16xf32>
    %62 = vector.extract_strided_slice %11 {offsets = [0, 32], sizes = [16, 32], strides = [1, 1]} : vector<16x64xf32> to vector<16x32xf32>
    %cst_26 = arith.constant dense<0.000000e+00> : vector<16x32xf32>
    %63 = tpu.matmul %61, %62, %cst_26 {dimension_numbers = #tpu.dot_dimension_numbers<[1], [0], [0], [1], [0, 0, 1, 1], [], []>} : vector<16x16xf32>, vector<16x32xf32>, vector<16x32xf32> -> vector<16x32xf32>
    %c0_27 = arith.constant 0 : index
    %c32 = arith.constant 32 : index
    %64 = vector.load %arg8[%c0_27, %c32] : memref<16x64xf32, #tpu.memory_space<vmem>>, vector<16x32xf32>
    tpu.vector_store %arg8[%c0_27, %c32], %63 {strides = array<i32>} : memref<16x64xf32, #tpu.memory_space<vmem>>, vector<16x32xf32>,
    %c0_28 = arith.constant 0 : index
    %c0_29 = arith.constant 0 : index
    %65 = vector.load %arg8[%c0_28, %c0_29] : memref<16x64xf32, #tpu.memory_space<vmem>>, vector<16x64xf32>
    %66 = vector.broadcast %2 : vector<1x64xf32> to vector<16x64xf32>
    %67 = arith.addf %65, %66 : vector<16x64xf32>
    %c0_30 = arith.constant 0 : index
    %c0_31 = arith.constant 0 : index
    %68 = vector.load %arg6[%c0_30, %c0_31] : memref<16x16xf32, #tpu.memory_space<vmem>>, vector<16x16xf32>
    %cst_32 = arith.constant 0.000000e+00 : f32
    %69 = vector.broadcast %cst_32 : f32 to vector<16x16xf32>
    %70 = arith.cmpf ogt, %68, %69 : vector<16x16xf32>
    %cst_33 = arith.constant dense<0.000000e+00> : vector<16x128xf32>
    %71 = tpu.matmul %67, %0, %cst_33 {dimension_numbers = #tpu.dot_dimension_numbers<[1], [0], [0], [1], [0, 0, 1, 1], [], []>} : vector<16x64xf32>, vector<64x128xf32>, vector<16x128xf32> -> vector<16x128xf32>
    %72 = vector.extract_strided_slice %71 {offsets = [0, 0], sizes = [16, 64], strides = [1, 1]} : vector<16x128xf32> to vector<16x64xf32>
    %cst_34 = arith.constant dense<0.000000e+00> : vector<8x16xf32>
    %73 = tpu.matmul %1, %67, %cst_34 {dimension_numbers = #tpu.dot_dimension_numbers<[1], [1], [0], [0], [0, 0, 1, 0], [], []>} : vector<8x64xf32>, vector<16x64xf32>, vector<8x16xf32> -> vector<8x16xf32>
    %74 = vector.extract_strided_slice %71 {offsets = [0, 64], sizes = [16, 1], strides = [1, 1]} : vector<16x128xf32> to vector<16x1xf32>
    %75 = vector.extract_strided_slice %73 {offsets = [0, 0], sizes = [1, 16], strides = [1, 1]} : vector<8x16xf32> to vector<1x16xf32>
    %76 = vector.broadcast %74 : vector<16x1xf32> to vector<16x16xf32>
    %77 = vector.broadcast %75 : vector<1x16xf32> to vector<16x16xf32>
    %78 = arith.addf %76, %77 : vector<16x16xf32>
    %cst_35 = arith.constant 0.000000e+00 : f32
    %79 = vector.broadcast %cst_35 : f32 to vector<16x16xf32>
    %80 = arith.cmpf ogt, %78, %79 : vector<16x16xf32>
    %cst_36 = arith.constant 1.000000e-01 : f32
    %81 = vector.broadcast %cst_36 : f32 to vector<16x16xf32>
    %82 = arith.mulf %81, %78 : vector<16x16xf32>
    %83 = arith.select %80, %78, %82 : vector<16x16xi1>, vector<16x16xf32>
    %cst_37 = arith.constant -1.000000e+30 : f32
    %84 = vector.broadcast %cst_37 : f32 to vector<16x16xf32>
    %85 = arith.select %70, %83, %84 : vector<16x16xi1>, vector<16x16xf32>
    %cst_38 = arith.constant dense<0xFF800000> : vector<16xf32>
    %86 = vector.multi_reduction <maximumf>, %85, %cst_38 [1] : vector<16x16xf32> to vector<16xf32>
    %87 = vector.shape_cast %86 : vector<16xf32> to vector<16x1xf32>
    %88 = vector.broadcast %87 : vector<16x1xf32> to vector<16x16xf32>
    %89 = arith.subf %85, %88 : vector<16x16xf32>
    %90 = math.exp %89 : vector<16x16xf32>
    %cst_39 = arith.constant dense<0.000000e+00> : vector<16xf32>
    %91 = vector.multi_reduction <add>, %90, %cst_39 [1] : vector<16x16xf32> to vector<16xf32>
    %92 = vector.shape_cast %91 : vector<16xf32> to vector<16x1xf32>
    %93 = tpu.reciprocal %92 {approx = true} : vector<16x1xf32> -> vector<16x1xf32>
    %94 = vector.broadcast %93 : vector<16x1xf32> to vector<16x16xf32>
    %95 = arith.mulf %90, %94 : vector<16x16xf32>
    %96 = arith.mulf %95, %68 : vector<16x16xf32>
    %97 = vector.extract_strided_slice %72 {offsets = [0, 0], sizes = [16, 32], strides = [1, 1]} : vector<16x64xf32> to vector<16x32xf32>
    %cst_40 = arith.constant dense<0.000000e+00> : vector<16x32xf32>
    %98 = tpu.matmul %96, %97, %cst_40 {dimension_numbers = #tpu.dot_dimension_numbers<[1], [0], [0], [1], [0, 0, 1, 1], [], []>} : vector<16x16xf32>, vector<16x32xf32>, vector<16x32xf32> -> vector<16x32xf32>
    %c0_41 = arith.constant 0 : index
    %c0_42 = arith.constant 0 : index
    %99 = vector.load %arg8[%c0_41, %c0_42] : memref<16x64xf32, #tpu.memory_space<vmem>>, vector<16x32xf32>
    tpu.vector_store %arg8[%c0_41, %c0_42], %98 {strides = array<i32>} : memref<16x64xf32, #tpu.memory_space<vmem>>, vector<16x32xf32>,
    %100 = vector.extract_strided_slice %71 {offsets = [0, 65], sizes = [16, 1], strides = [1, 1]} : vector<16x128xf32> to vector<16x1xf32>
    %101 = vector.extract_strided_slice %73 {offsets = [1, 0], sizes = [1, 16], strides = [1, 1]} : vector<8x16xf32> to vector<1x16xf32>
    %102 = vector.broadcast %100 : vector<16x1xf32> to vector<16x16xf32>
    %103 = vector.broadcast %101 : vector<1x16xf32> to vector<16x16xf32>
    %104 = arith.addf %102, %103 : vector<16x16xf32>
    %cst_43 = arith.constant 0.000000e+00 : f32
    %105 = vector.broadcast %cst_43 : f32 to vector<16x16xf32>
    %106 = arith.cmpf ogt, %104, %105 : vector<16x16xf32>
    %cst_44 = arith.constant 1.000000e-01 : f32
    %107 = vector.broadcast %cst_44 : f32 to vector<16x16xf32>
    %108 = arith.mulf %107, %104 : vector<16x16xf32>
    %109 = arith.select %106, %104, %108 : vector<16x16xi1>, vector<16x16xf32>
    %cst_45 = arith.constant -1.000000e+30 : f32
    %110 = vector.broadcast %cst_45 : f32 to vector<16x16xf32>
    %111 = arith.select %70, %109, %110 : vector<16x16xi1>, vector<16x16xf32>
    %cst_46 = arith.constant dense<0xFF800000> : vector<16xf32>
    %112 = vector.multi_reduction <maximumf>, %111, %cst_46 [1] : vector<16x16xf32> to vector<16xf32>
    %113 = vector.shape_cast %112 : vector<16xf32> to vector<16x1xf32>
    %114 = vector.broadcast %113 : vector<16x1xf32> to vector<16x16xf32>
    %115 = arith.subf %111, %114 : vector<16x16xf32>
    %116 = math.exp %115 : vector<16x16xf32>
    %cst_47 = arith.constant dense<0.000000e+00> : vector<16xf32>
    %117 = vector.multi_reduction <add>, %116, %cst_47 [1] : vector<16x16xf32> to vector<16xf32>
    %118 = vector.shape_cast %117 : vector<16xf32> to vector<16x1xf32>
    %119 = tpu.reciprocal %118 {approx = true} : vector<16x1xf32> -> vector<16x1xf32>
    %120 = vector.broadcast %119 : vector<16x1xf32> to vector<16x16xf32>
    %121 = arith.mulf %116, %120 : vector<16x16xf32>
    %122 = arith.mulf %121, %68 : vector<16x16xf32>
    %123 = vector.extract_strided_slice %72 {offsets = [0, 32], sizes = [16, 32], strides = [1, 1]} : vector<16x64xf32> to vector<16x32xf32>
    %cst_48 = arith.constant dense<0.000000e+00> : vector<16x32xf32>
    %124 = tpu.matmul %122, %123, %cst_48 {dimension_numbers = #tpu.dot_dimension_numbers<[1], [0], [0], [1], [0, 0, 1, 1], [], []>} : vector<16x16xf32>, vector<16x32xf32>, vector<16x32xf32> -> vector<16x32xf32>
    %c0_49 = arith.constant 0 : index
    %c32_50 = arith.constant 32 : index
    %125 = vector.load %arg8[%c0_49, %c32_50] : memref<16x64xf32, #tpu.memory_space<vmem>>, vector<16x32xf32>
    tpu.vector_store %arg8[%c0_49, %c32_50], %124 {strides = array<i32>} : memref<16x64xf32, #tpu.memory_space<vmem>>, vector<16x32xf32>,
    %c0_51 = arith.constant 0 : index
    %c0_52 = arith.constant 0 : index
    %126 = vector.load %arg8[%c0_51, %c0_52] : memref<16x64xf32, #tpu.memory_space<vmem>>, vector<16x64xf32>
    %127 = vector.broadcast %2 : vector<1x64xf32> to vector<16x64xf32>
    %128 = arith.addf %126, %127 : vector<16x64xf32>
    %cst_53 = arith.constant 0.000000e+00 : f32
    %129 = vector.broadcast %cst_53 : f32 to vector<16x64xf32>
    %130 = arith.addf %129, %67 : vector<16x64xf32>
    %131 = arith.addf %130, %128 : vector<16x64xf32>
    %c0_54 = arith.constant 0 : index
    %c0_55 = arith.constant 0 : index
    %132 = vector.load %arg7[%c0_54, %c0_55] : memref<16x64xf32, #tpu.memory_space<vmem>>, vector<16x64xf32>
    tpu.vector_store %arg7[%c0_54, %c0_55], %131 {strides = array<i32>} : memref<16x64xf32, #tpu.memory_space<vmem>>, vector<16x64xf32>,
    return
  }
}

</mosaic_0001>

<bundles_post_ra>
// kernel: tpu_custom_call.1
= control target key start
LH: loop header
LB: loop body
LE: loop exit
PB: predicated region body
PF: predicated region fallthrough
CT: control target
= control target key end

     0   :  { %12 = vsyncpa [#allocation4], 0  ;;  %s1587_s0 = inlined_call_operand.hbm [shape: f32[16,64], index: 0, kind: input, shape index: {}]   ;;  %s1588_s1 = inlined_call_operand.vmem [shape: f32[1,64], index: 1, kind: input, shape index: {}]   ;;  %s1589_s2 = inlined_call_operand.hbm [shape: f32[64,128], index: 2, kind: input, shape index: {}]   ;;  %s1590_s3 = inlined_call_operand.hbm [shape: f32[8,64], index: 3, kind: input, shape index: {}]   ;;  %s1591_s4 = inlined_call_operand.vmem [shape: f32[1,64], index: 4, kind: input, shape index: {}]   ;;  %s1592_s5 = inlined_call_operand.hbm [shape: f32[16,16], index: 5, kind: input, shape index: {}]   ;;  %s1593_s6 = inlined_call_operand.hbm [shape: f32[16,16], index: 6, kind: input, shape index: {}]   ;;  %s1594_s7 = inlined_call_operand.hbm [shape: f32[16,64], index: 7, kind: output, shape index: {}]  }
   0x1   :  { %13 = vsyncpa [#allocation7], 0 }
   0x2   :  { %14 = vsyncpa [#allocation10], 0 }
   0x3   :  { %15 = vsyncpa [#allocation5], 0  ;;  %s1339_s24 = smov [#allocation6]   ;;  %s1340_s26 = smov [#allocation9]  }
   0x4   :  { %s35_s25 = sshll.u32 %s1339_s24, 4  ;;  %s59_s27 = sshll.u32 %s1340_s26, 4  ;;  %s36_s25 = int_to_ptr.vmem [resolvable:$true] %s35_s25  ;;  %s60_s27 = int_to_ptr.vmem [resolvable:$true] %s59_s27 }
   0x5   :  { %s1219_s28 = scalar_lea.vmem %s36_s25, 1024  ;;  %p1224_p1 = scmp.lt.s32.totalorder %s36_s25, %s36_s25 }
   0x6   :  { %p1220_p0 = scmp.ne.s32.totalorder %s36_s25, %s1219_s28  ;;  %p1225_p2 = scmp.lt.s32.totalorder %s1219_s28, %s1219_s28 }
   0x8   :  { %p1226_p3 = por %p1225_p2, %p1224_p1 }
   0xa   :  { %p1227_p4 = pnand %p1226_p3, %p1220_p0 }
   0xc   :  { %1230 = shalt.err (!%p1227_p4)
}
   0xd   :  { %s1341_s29 = smov 128   ;;  %s1342_s30 = smov 8  }
   0xe   :  { %41 = dma.hbm_to_vmem [thread:$0]  %s1589_s2, 1024, %s36_s25, [#allocation7], %s1341_s29, %s1341_s29, %s1342_s30  }
   0xf   :  { %s1239_s10 = scalar_lea.vmem %s60_s27, 256  ;;  %p1244_p6 = scmp.lt.s32.totalorder %s60_s27, %s60_s27 }
  0x10   :  { %p1240_p5 = scmp.ne.s32.totalorder %s60_s27, %s1239_s10  ;;  %p1245_p7 = scmp.lt.s32.totalorder %s1239_s10, %s1239_s10 }
  0x12   :  { %p1246_p8 = por %p1245_p7, %p1244_p6 }
  0x14   :  { %p1247_p9 = pnand %p1246_p8, %p1240_p5 }
  0x16   :  { %1250 = shalt.err (!%p1247_p9)
}
  0x17   :  { %65 = dma.hbm_to_vmem [thread:$0]  %s1592_s5, 256, %s60_s27, [#allocation10], %s1341_s29, %s1341_s29, %s1342_s30  }
  0x18   :  { %s1343_s13 = smov [#allocation3]   ;;  %s1344_s15 = smov [#allocation8]  }
  0x19   :  { %s21_s14 = sshll.u32 %s1343_s13, 4  ;;  %s48_s16 = sshll.u32 %s1344_s15, 4  ;;  %s22_s14 = int_to_ptr.vmem [resolvable:$true] %s21_s14  ;;  %s49_s16 = int_to_ptr.vmem [resolvable:$true] %s48_s16 }
  0x1a   :  { %s1259_s2 = scalar_lea.vmem %s22_s14, 256  ;;  %p1264_p11 = scmp.lt.s32.totalorder %s22_s14, %s22_s14 }
  0x1b   :  { %p1260_p10 = scmp.ne.s32.totalorder %s22_s14, %s1259_s2  ;;  %p1265_p12 = scmp.lt.s32.totalorder %s1259_s2, %s1259_s2 }
  0x1d   :  { %p1266_p13 = por %p1265_p12, %p1264_p11 }
  0x1f   :  { %p1267_p0 = pnand %p1266_p13, %p1260_p10 }
  0x21   :  { %1270 = shalt.err (!%p1267_p0)
}
  0x22   :  { %27 = dma.hbm_to_vmem [thread:$0]  %s1587_s0, 256, %s22_s14, [#allocation4], %s1341_s29, %s1341_s29, %s1342_s30  }
  0x23   :  { %s1279_s5 = scalar_lea.vmem %s49_s16, 128  ;;  %p1284_p2 = scmp.lt.s32.totalorder %s49_s16, %s49_s16 }
  0x24   :  { %p1280_p1 = scmp.ne.s32.totalorder %s49_s16, %s1279_s5  ;;  %p1285_p3 = scmp.lt.s32.totalorder %s1279_s5, %s1279_s5 }
  0x26   :  { %p1286_p4 = por %p1285_p3, %p1284_p2 }
  0x28   :  { %p1287_p5 = pnand %p1286_p4, %p1280_p1 }
  0x2a   :  { %1290 = shalt.err (!%p1287_p5)
}
  0x2b   :  { %51 = dma.hbm_to_vmem [thread:$0]  %s1590_s3, 128, %s49_s16, [#allocation7]  }
  0x2c   :  { %s1345_s21 = smov [#allocation11]  }
  0x2d   :  { %s71_s22 = sshll.u32 %s1345_s21, 4  ;;  %s72_s22 = int_to_ptr.vmem [resolvable:$true] %s71_s22 }
  0x2e   :  { %s1299_s23 = scalar_lea.vmem %s72_s22, 256  ;;  %p1304_p7 = scmp.lt.s32.totalorder %s72_s22, %s72_s22 }
  0x2f   :  { %p1300_p6 = scmp.ne.s32.totalorder %s72_s22, %s1299_s23  ;;  %p1305_p8 = scmp.lt.s32.totalorder %s1299_s23, %s1299_s23 }
  0x31   :  { %p1306_p9 = por %p1305_p8, %p1304_p7 }
  0x33   :  { %p1307_p10 = pnand %p1306_p9, %p1300_p6 }
  0x35   :  { %1310 = shalt.err (!%p1307_p10)
}
  0x36   :  { %77 = dma.hbm_to_vmem [thread:$0]  %s1593_s6, 256, %s72_s22, [#allocation10], %s1341_s29, %s1341_s29, %s1342_s30  }
  0x37   :  { %1331 = dma.done.wait [#allocation4], 256  }
  0x38   :  { %1332 = vsyncadd [#allocation4], 4294967040 }
  0x39   :  { %1333 = dma.done.wait [#allocation7], 1152  }
  0x3a   :  { %1334 = vsyncadd [#allocation7], 4294966144 }
  0x3b   :  { %1335 = dma.done.wait [#allocation10], 512  }
  0x3c   :  { %1336 = vsyncadd [#allocation10], 4294966784  ;;  %v1346_v0 = vmov 0.0   ;;  %vm1347_vm0 = vmmov 0   ;;  %v100_v1 = vld [vmem:[#allocation6 + $0x38] sm:$0xff]  ;;  %v99_v2 = vld [vmem:[#allocation6 + $0x30] sm:$0xff]  ;;  %v283_v21 = vlaneseq }
  0x3d   :  { %1099 = vmatprep.subr.mxu1 %v1346_v0  ;;  %1103 = vmatprep.mubr.msk.f32.mxu1 %vm1347_vm0, %v1346_v0  ;;  %v98_v3 = vld [vmem:[#allocation6 + $0x28] sm:$0xff]  ;;  %v103_v4 = vld [vmem:[#allocation3] sm:$0xff]  ;;  %v104_v5 = vld [vmem:[#allocation3 + $0x8] sm:$0xff]  ;;  %vm118_vm1 = vcmask 523264   ;;  %v1348_v15 = vmov 65   ;;  %v1349_v16 = vmov 64  }
  0x3e   :  { %1080 = vmatprep.subr.mxu0 %v100_v1  ;;  %v1018_v6 = vld [vmem:[%s1588_s1] ss:$0 sm:$0xff]  ;;  %v96_v10 = vld [vmem:[#allocation6 + $0x18] sm:$0xff]  ;;  %v95_v11 = vld [vmem:[#allocation6 + $0x10] sm:$0xff]  ;;  %1175 = vset.pattern.permute.xlu1 %v1348_v15  ;;  %v1448_v22 = vshrl.u32 %v283_v21, 7  ;;  %vm297_vm5 = vcmask 130048  }
  0x3f   :  { %1081 = vmatpush3.msra.mxu0 %v100_v1  ;;  %v97_v7 = vld [vmem:[#allocation6 + $0x20] sm:$0xff]  ;;  %v112_v8 = vadd.f32 %v1018_v6, %v103_v4  ;;  %v113_v9 = vadd.f32 %v1018_v6, %v104_v5  ;;  %v94_v12 = vld [vmem:[#allocation6 + $0x8] sm:$0xff]  ;;  %1174 = vset.pattern.permute.xlu0 %v1349_v16  ;;  %v1459_v36 = vld [vmem:[#allocation9 + $0x8] sm:$0xff]  ;;  %s1350_s1 = smov 96   ;;  %vm403_vm9 = vcmask 261120   ;;  %s1351_s25 = smov 32  }
  0x40   :  { %1082 = vmatprep.subr.mxu0 %v99_v2  ;;  %v1430_v13 = vld [vmem:[#allocation8] sm:$0xff]  ;;  %v285_v23 = vsub.s32 0, %v1448_v22  ;;  %v416_v24 = vsub.s32 1, %v1448_v22  ;;  %v1456_v27 = vld [vmem:[#allocation9] sm:$0xff]  ;;  %vm117_vm6 = vcmp.gt.f32.partialorder %v1459_v36, 0.0  ;;  %vm547_vm10 = vcmask 523520  }
  0x41   :  { %1083 = vmatpush3.msra.mxu0 %v99_v2  ;;  %1096 = vmatprep.mubr.msk.f32.mxu0 %vm118_vm1, %v112_v8  ;;  %v93_v14 = vld [vmem:[#allocation6] sm:$0xff]  ;;  %vm116_vm2 = vcmp.gt.f32.partialorder %v1456_v27, 0.0 }
  0x42   :  { %1084 = vmatprep.subr.mxu0 %v98_v3  ;;  %1100 = vmatpush3.xpose.msk.msra.mxu1 %vm118_vm1, %v113_v9 }
  0x43   :  { %1085 = vmatpush3.msra.mxu0 %v98_v3  ;;  %1101 = vmatprep.subr.mxu1 %v1346_v0 }
  0x44   :  { %1086 = vmatprep.subr.mxu0 %v97_v7 }
  0x45   :  { %1087 = vmatpush3.msra.mxu0 %v97_v7 }
  0x46   :  { %1088 = vmatprep.subr.mxu0 %v96_v10  ;;  %1102 = vmatpush3.xpose.msk.msra.mxu1 %vm118_vm1, %v112_v8 }
  0x47   :  { %1089 = vmatpush3.msra.mxu0 %v96_v10 }
  0x48   :  { %1090 = vmatprep.subr.mxu0 %v95_v11 }
  0x49   :  { %1091 = vmatpush3.msra.mxu0 %v95_v11  ;;  %1104 = vmatmul.mubr.msk.f32.vlgmr.msra.gmra.mxu1 %vm118_vm1, %v1430_v13 }
  0x4a   :  { %1092 = vmatprep.subr.mxu0 %v94_v12 }
  0x4b   :  { %1093 = vmatpush3.msra.mxu0 %v94_v12 }
  0x4c   :  { %1094 = vmatprep.subr.mxu0 %v93_v14 }
  0x4d   :  { %1095 = vmatpush3.msra.mxu0 %v93_v14 }
  0x4e   :  { %1097 = vmatmul.mubr.msk.f32.vlgmr.msra.gmra.mxu0 %vm118_vm1, %v113_v9  ;;  %1120 = vmatprep.subr.mxu0 %v100_v1 }
  0x4f   :  { %1121 = vmatpush3.msra.mxu0 %v100_v1 }
  0x50   :  { %1122 = vmatprep.subr.mxu0 %v99_v2 }
  0x51   :  { %1123 = vmatpush3.msra.mxu0 %v99_v2 }
  0x52   :  { %1124 = vmatprep.subr.mxu0 %v98_v3 }
  0x53   :  { %1125 = vmatpush3.msra.mxu0 %v98_v3 }
  0x54   :  { %1126 = vmatprep.subr.mxu0 %v97_v7 }
  0x55   :  { %1127 = vmatpush3.msra.mxu0 %v97_v7 }
  0x56   :  { %1128 = vmatprep.subr.mxu0 %v96_v10 }
  0x57   :  { %1129 = vmatpush3.msra.mxu0 %v96_v10 }
  0x58   :  { %1130 = vmatprep.subr.mxu0 %v95_v11 }
  0x59   :  { %1131 = vmatpush3.msra.mxu0 %v95_v11 }
  0x5a   :  { %1132 = vmatprep.subr.mxu0 %v94_v12 }
  0x5b   :  { %1133 = vmatpush3.msra.mxu0 %v94_v12 }
  0x5c   :  { %1134 = vmatprep.subr.mxu0 %v93_v14 }
  0x5d   :  { %1135 = vmatpush3.msra.mxu0 %v93_v14 }
 0x109   :  { %v269_v17 = vpop.f32.mrf.mxu1 }
 0x10a   :  { %v286_v25 = vrot.slane %v269_v17, %v285_v23  ;;  %v417_v26 = vrot.slane %v269_v17, %v416_v24 }
 0x10b   :  { %v1105_v18 = vpop.f32.mrf.mxu1 }
 0x10e   :  { %v1436_v19 = vpop.f32.mrf.mxu0 }
 0x10f   :  { %1106 = vmatprep.subr.mxu1 %v1436_v19 }
 0x110   :  { %v1439_v20 = vpop.f32.mrf.mxu0  ;;  %1107 = vmatpush3.msra.mxu1 %v1436_v19 }
 0x111   :  { %407 = vperm.xlu1 %1175, %v1439_v20   ;;  %275 = vperm.xlu0 %1174, %v1439_v20  }
 0x112   :  { %1108 = vmatprep.subr.mxu1 %v1439_v20 }
 0x113   :  { %1109 = vmatpush3.msra.mxu1 %v1439_v20 }
 0x115   :  { %411 = vperm.xlu1 %1175, %v1436_v19   ;;  %280 = vperm.xlu0 %1174, %v1436_v19  }
 0x119   :  { %1176 = vset.pattern.permute.xlu1 %v1349_v16 }
 0x18c   :  { %v408_v28 = vpop.permute.xlu1 %407  ;;  %v276_v29 = vpop.permute.xlu0 %275 }
 0x18d   :  { %v418_v30 = vadd.f32 %v417_v26, %v408_v28  ;;  %v287_v31 = vadd.f32 %v286_v25, %v276_v29 }
 0x18f   :  { %v422_v32 = vmul.f32 0.1, %v418_v30  ;;  %v291_v33 = vmul.f32 0.1, %v287_v31  ;;  %vm289_vm3 = vcmp.gt.f32.partialorder %v287_v31, 0.0  ;;  %vm420_vm4 = vcmp.gt.f32.partialorder %v418_v30, 0.0 }
 0x190   :  { %v412_v34 = vpop.permute.xlu1 %411  ;;  %v281_v35 = vpop.permute.xlu0 %280 }
 0x191   :  { %v419_v37 = vadd.f32 %v417_v26, %v412_v34  ;;  %v288_v38 = vadd.f32 %v286_v25, %v281_v35  ;;  %v293_v39 = vsel %vm289_vm3, %v287_v31, %v291_v33  ;;  %v424_v40 = vsel %vm420_vm4, %v418_v30, %v422_v32 }
 0x192   :  { %v295_v41 = vsel %vm116_vm2, %v293_v39, -1e+30  ;;  %v426_v45 = vsel %vm116_vm2, %v424_v40, -1e+30  ;;  %v1498_v39 = vld [vmem:[%s1591_s4] ss:$0 sm:$0xff] }
 0x193   :  { %v423_v42 = vmul.f32 0.1, %v419_v37  ;;  %v292_v43 = vmul.f32 0.1, %v288_v38  ;;  %v298_v44 = vsel %vm297_vm5, %v295_v41, -inf  ;;  %vm290_vm7 = vcmp.gt.f32.partialorder %v288_v38, 0.0 }
 0x194   :  { %299 = vmax.xlane.f32.xlu0 %v298_v44  ;;  %vm421_vm8 = vcmp.gt.f32.partialorder %v419_v37, 0.0  ;;  %v428_v49 = vsel %vm297_vm5, %v426_v45, -inf  ;;  %s1352_s4 = smov [#allocation12]  }
 0x195   :  { %v294_v46 = vsel %vm290_vm7, %v288_v38, %v292_v43  ;;  %v425_v47 = vsel %vm421_vm8, %v419_v37, %v423_v42  ;;  %s1004_s28 = sshll.u32 %s1352_s4, 4  ;;  %s1005_s28 = int_to_ptr.vmem [resolvable:$true] %s1004_s28 }
 0x196   :  { %v296_v48 = vsel %vm117_vm6, %v294_v46, -1e+30  ;;  %v427_v51 = vsel %vm117_vm6, %v425_v47, -1e+30  ;;  %s1311_s8 = scalar_lea.vmem %s1005_s28, 256  ;;  %p1316_p12 = scmp.lt.s32.totalorder %s1005_s28, %s1005_s28 }
 0x197   :  { %v301_v50 = vsel %vm297_vm5, %v296_v48, -inf  ;;  %v431_v52 = vsel %vm297_vm5, %v427_v51, -inf  ;;  %p1312_p11 = scmp.ne.s32.totalorder %s1005_s28, %s1311_s8  ;;  %p1317_p13 = scmp.lt.s32.totalorder %s1311_s8, %s1311_s8 }
 0x198   :  { %429 = vmax.xlane.f32.xlu0 %v428_v49  ;;  %302 = vmax.xlane.f32.xlu1 %v301_v50 }
 0x199   :  { %p1318_p0 = por %p1317_p13, %p1316_p12 }
 0x19b   :  { %p1319_p1 = pnand %p1318_p0, %p1312_p11 }
 0x19c   :  { %432 = vmax.xlane.f32.xlu0 %v431_v52 }
 0x21d   :  { %v300_v53 = vpop.xlane.xlu0 %299 }
 0x21e   :  { %v304_v54 = vsub.f32 %v295_v41, %v300_v53 }
 0x220   :  { %v306_v55 = vmul.f32 1.442695, %v304_v54 }
 0x221   :  { %v303_v56 = vpop.xlane.xlu1 %302  ;;  %v430_v57 = vpop.xlane.xlu0 %429 }
 0x222   :  { %1179 = vpow2.f32 %v306_v55  ;;  %v305_v58 = vsub.f32 %v296_v48, %v303_v56  ;;  %v434_v59 = vsub.f32 %v426_v45, %v430_v57  ;;  %v1533_v48 = vld [vmem:[#allocation11 + $0x8] sm:$0xff] }
 0x223   :  { %vm563_vm11 = vcmp.gt.f32.partialorder %v1533_v48, 0.0 }
 0x224   :  { %v308_v60 = vmul.f32 1.442695, %v305_v58  ;;  %v436_v61 = vmul.f32 1.442695, %v434_v59 }
 0x225   :  { %v433_v62 = vpop.xlane.xlu0 %432 }
 0x226   :  { %1181 = vpow2.f32 %v308_v60  ;;  %v435_v63 = vsub.f32 %v427_v51, %v433_v62  ;;  %v1535_v51 = vld [vmem:[#allocation11] sm:$0xff] }
 0x227   :  { %1183 = vpow2.f32 %v436_v61  ;;  %vm562_vm13 = vcmp.gt.f32.partialorder %v1535_v51, 0.0 }
 0x228   :  { %v438_v1 = vmul.f32 1.442695, %v435_v63 }
 0x22a   :  { %1185 = vpow2.f32 %v438_v1 }
 0x22f   :  { %v1180_v2 = vpop.eup %1179 }
 0x230   :  { %v310_v3 = vsel %vm297_vm5, %v1180_v2, 0.0 }
 0x231   :  { %311 = vadd.xlane.f32.xlu1 %v310_v3 }
 0x233   :  { %v1182_v4 = vpop.eup %1181 }
 0x234   :  { %v1184_v5 = vpop.eup %1183  ;;  %v313_v6 = vsel %vm297_vm5, %v1182_v4, 0.0 }
 0x235   :  { %314 = vadd.xlane.f32.xlu0 %v313_v6  ;;  %v440_v7 = vsel %vm297_vm5, %v1184_v5, 0.0 }
 0x236   :  { %441 = vadd.xlane.f32.xlu1 %v440_v7 }
 0x237   :  { %v1186_v8 = vpop.eup %1185 }
 0x238   :  { %v443_v9 = vsel %vm297_vm5, %v1186_v8, 0.0 }
 0x239   :  { %444 = vadd.xlane.f32.xlu0 %v443_v9 }
 0x247   :  { %454 = vrot.lane.b32.xlu1 %v1436_v19, %s1350_s1 }
 0x24f   :  { %452 = vrot.lane.b32.xlu0 %v1439_v20, %s1350_s1 }
 0x2ba   :  { %v312_v10 = vpop.xlane.xlu1 %311 }
 0x2bb   :  { %1187 = vrcp.f32 %v312_v10 }
 0x2be   :  { %v315_v11 = vpop.xlane.xlu0 %314 }
 0x2bf   :  { %v442_v12 = vpop.xlane.xlu1 %441  ;;  %1189 = vrcp.f32 %v315_v11 }
 0x2c0   :  { %1191 = vrcp.f32 %v442_v12 }
 0x2c2   :  { %v445_v14 = vpop.xlane.xlu0 %444 }
 0x2c3   :  { %v455_v16 = vpop.permute.xlu1 %454  ;;  %1193 = vrcp.f32 %v445_v14 }
 0x2c4   :  { %1113 = vmatprep.subr.mxu1 %v455_v16 }
 0x2c6   :  { %v453_v32 = vpop.permute.xlu0 %452 }
 0x2c8   :  { %v1188_v17 = vpop.eup %1187 }
 0x2c9   :  { %v318_v18 = vmul.f32 %v1188_v17, %v1180_v2 }
 0x2cb   :  { %v320_v21 = vmul.f32 %v318_v18, %v1456_v27 }
 0x2cc   :  { %v1190_v25 = vpop.eup %1189 }
 0x2cd   :  { %v1192_v26 = vpop.eup %1191  ;;  %1110 = vmatprep.mubr.msk.f32.mxu1 %vm297_vm5, %v320_v21  ;;  %v319_v19 = vmul.f32 %v1190_v25, %v1182_v4 }
 0x2ce   :  { %v448_v20 = vmul.f32 %v1192_v26, %v1184_v5 }
 0x2cf   :  { %v321_v28 = vmul.f32 %v319_v19, %v1459_v36 }
 0x2d0   :  { %v1194_v29 = vpop.eup %1193  ;;  %v450_v30 = vmul.f32 %v448_v20, %v1456_v27 }
 0x2d1   :  { %1111 = vmatmul.mubr.msk.f32.vlgmr.msra.gmra.mxu1 %vm297_vm5, %v321_v28  ;;  %v449_v31 = vmul.f32 %v1194_v29, %v1186_v8 }
 0x2d2   :  { %1114 = vmatpush3.msra.mxu1 %v455_v16  ;;  %1117 = vmatprep.mubr.msk.f32.mxu1 %vm297_vm5, %v450_v30 }
 0x2d3   :  { %1115 = vmatprep.subr.mxu1 %v453_v32  ;;  %v451_v33 = vmul.f32 %v449_v31, %v1459_v36 }
 0x2d4   :  { %1116 = vmatpush3.msra.mxu1 %v453_v32 }
 0x2d5   :  { %1118 = vmatmul.mubr.msk.f32.vlgmr.msra.gmra.mxu1 %vm297_vm5, %v451_v33  ;;  %1139 = vmatprep.subr.mxu1 %v1346_v0 }
 0x2d6   :  { %1143 = vmatprep.mubr.msk.f32.mxu1 %vm1347_vm0, %v1346_v0 }
 0x391   :  { %v1112_v27 = vpop.f32.mrf.mxu1 }
 0x392   :  { %405 = vst.msk [vmem:[#allocation2 + $0x8] sm:$0xff] %vm403_vm9, %v1112_v27 }
 0x393   :  { %v394_v34 = vpop.f32.mrf.mxu1 }
 0x394   :  { %404 = vst.msk [vmem:[#allocation2] sm:$0xff] %vm403_vm9, %v394_v34 }
 0x395   :  { %v1119_v35 = vpop.f32.mrf.mxu1 }
 0x397   :  { %v530_v37 = vpop.f32.mrf.mxu1 }
 0x398   :  { %541 = vrot.lane.b32.xlu1 %v530_v37, %s1351_s25 }
 0x39c   :  { %543 = vrot.lane.b32.xlu1 %v1119_v35, %s1351_s25 }
 0x40a   :  { %v542_v36 = vpop.permute.xlu1 %541 }
 0x40b   :  { %548 = vst.msk [vmem:[#allocation2] sm:$0xff] %vm547_vm10, %v542_v36 }
 0x40e   :  { %v544_v38 = vpop.permute.xlu1 %543 }
 0x40f   :  { %549 = vst.msk [vmem:[#allocation2 + $0x8] sm:$0xff] %vm547_vm10, %v544_v38 }
 0x412   :  { %v550_v40 = vld [vmem:[#allocation2] sm:$0xff] }
 0x413   :  { %v1501_v41 = vadd.f32 %v1498_v39, %v550_v40 }
 0x415   :  { %1136 = vmatprep.mubr.msk.f32.mxu0 %vm118_vm1, %v1501_v41 }
 0x416   :  { %v551_v42 = vld [vmem:[#allocation2 + $0x8] sm:$0xff] }
 0x417   :  { %v1506_v43 = vadd.f32 %v1498_v39, %v551_v42 }
 0x419   :  { %1137 = vmatmul.mubr.msk.f32.vlgmr.msra.gmra.mxu0 %vm118_vm1, %v1506_v43  ;;  %1140 = vmatpush3.xpose.msk.msra.mxu1 %vm118_vm1, %v1506_v43 }
 0x41a   :  { %1141 = vmatprep.subr.mxu1 %v1346_v0 }
 0x41d   :  { %1142 = vmatpush3.xpose.msk.msra.mxu1 %vm118_vm1, %v1501_v41 }
 0x420   :  { %1144 = vmatmul.mubr.msk.f32.vlgmr.msra.gmra.mxu1 %vm118_vm1, %v1430_v13 }
 0x4d9   :  { %v1517_v44 = vpop.f32.mrf.mxu0 }
 0x4da   :  { %722 = vperm.xlu1 %1176, %v1517_v44   ;;  %1146 = vmatprep.subr.mxu1 %v1517_v44 }
 0x4db   :  { %v1521_v45 = vpop.f32.mrf.mxu0  ;;  %1147 = vmatpush3.msra.mxu1 %v1517_v44 }
 0x4dc   :  { %717 = vperm.xlu0 %1174, %v1521_v45   ;;  %1148 = vmatprep.subr.mxu1 %v1521_v45 }
 0x4dd   :  { %1149 = vmatpush3.msra.mxu1 %v1521_v45 }
 0x4de   :  { %1178 = vset.pattern.permute.xlu1 %v1348_v15 }
 0x4df   :  { %851 = vperm.xlu1 %1178, %v1517_v44  }
 0x4e0   :  { %1177 = vset.pattern.permute.xlu0 %v1348_v15  ;;  %v711_v0 = vpop.f32.mrf.mxu1 }
 0x4e1   :  { %847 = vperm.xlu0 %1177, %v1521_v45   ;;  %v728_v46 = vrot.slane %v711_v0, %v285_v23  ;;  %v857_v15 = vrot.slane %v711_v0, %v416_v24 }
 0x4e2   :  { %v1145_v13 = vpop.f32.mrf.mxu1 }
 0x555   :  { %v723_v47 = vpop.permute.xlu1 %722 }
 0x556   :  { %v730_v49 = vadd.f32 %v728_v46, %v723_v47 }
 0x557   :  { %v718_v50 = vpop.permute.xlu0 %717 }
 0x558   :  { %v734_v52 = vmul.f32 0.1, %v730_v49  ;;  %v729_v53 = vadd.f32 %v728_v46, %v718_v50  ;;  %vm732_vm12 = vcmp.gt.f32.partialorder %v730_v49, 0.0 }
 0x55a   :  { %v733_v54 = vmul.f32 0.1, %v729_v53  ;;  %v852_v55 = vpop.permute.xlu1 %851  ;;  %v736_v56 = vsel %vm732_vm12, %v730_v49, %v734_v52  ;;  %vm731_vm14 = vcmp.gt.f32.partialorder %v729_v53, 0.0 }
 0x55b   :  { %v859_v23 = vadd.f32 %v857_v15, %v852_v55  ;;  %v738_v57 = vsel %vm563_vm11, %v736_v56, -1e+30 }
 0x55c   :  { %v848_v58 = vpop.permute.xlu0 %847  ;;  %v742_v59 = vsel %vm297_vm5, %v738_v57, -inf  ;;  %v735_v60 = vsel %vm731_vm14, %v729_v53, %v733_v54 }
 0x55d   :  { %v863_v61 = vmul.f32 0.1, %v859_v23  ;;  %v858_v62 = vadd.f32 %v857_v15, %v848_v58  ;;  %743 = vmax.xlane.f32.xlu0 %v742_v59  ;;  %v737_v22 = vsel %vm562_vm13, %v735_v60, -1e+30  ;;  %vm861_vm15 = vcmp.gt.f32.partialorder %v859_v23, 0.0 }
 0x55e   :  { %v739_v24 = vsel %vm297_vm5, %v737_v22, -inf }
 0x55f   :  { %v862_v63 = vmul.f32 0.1, %v858_v62  ;;  %740 = vmax.xlane.f32.xlu1 %v739_v24  ;;  %v865_v1 = vsel %vm861_vm15, %v859_v23, %v863_v61  ;;  %vm860_vm0 = vcmp.gt.f32.partialorder %v858_v62, 0.0 }
 0x560   :  { %v867_v2 = vsel %vm563_vm11, %v865_v1, -1e+30 }
 0x561   :  { %v871_v3 = vsel %vm297_vm5, %v867_v2, -inf  ;;  %v864_v4 = vsel %vm860_vm0, %v858_v62, %v862_v63 }
 0x562   :  { %v866_v5 = vsel %vm562_vm13, %v864_v4, -1e+30 }
 0x563   :  { %872 = vmax.xlane.f32.xlu1 %v871_v3  ;;  %v868_v6 = vsel %vm297_vm5, %v866_v5, -inf }
 0x564   :  { %869 = vmax.xlane.f32.xlu0 %v868_v6 }
 0x5e6   :  { %v744_v7 = vpop.xlane.xlu0 %743 }
 0x5e7   :  { %v746_v8 = vsub.f32 %v738_v57, %v744_v7 }
 0x5e8   :  { %v741_v9 = vpop.xlane.xlu1 %740 }
 0x5e9   :  { %v749_v10 = vmul.f32 1.442695, %v746_v8  ;;  %v745_v11 = vsub.f32 %v737_v22, %v741_v9 }
 0x5eb   :  { %1195 = vpow2.f32 %v749_v10  ;;  %v747_v12 = vmul.f32 1.442695, %v745_v11 }
 0x5ec   :  { %v873_v14 = vpop.xlane.xlu1 %872 }
 0x5ed   :  { %1197 = vpow2.f32 %v747_v12  ;;  %v875_v16 = vsub.f32 %v867_v2, %v873_v14  ;;  %v870_v17 = vpop.xlane.xlu0 %869 }
 0x5ee   :  { %v874_v18 = vsub.f32 %v866_v5, %v870_v17 }
 0x5ef   :  { %v878_v21 = vmul.f32 1.442695, %v875_v16 }
 0x5f0   :  { %v876_v25 = vmul.f32 1.442695, %v874_v18 }
 0x5f1   :  { %1199 = vpow2.f32 %v878_v21 }
 0x5f2   :  { %1201 = vpow2.f32 %v876_v25 }
 0x5f8   :  { %v1196_v26 = vpop.eup %1195 }
 0x5f9   :  { %v754_v19 = vsel %vm297_vm5, %v1196_v26, 0.0 }
 0x5fa   :  { %v1198_v20 = vpop.eup %1197  ;;  %755 = vadd.xlane.f32.xlu1 %v754_v19 }
 0x5fb   :  { %v751_v28 = vsel %vm297_vm5, %v1198_v20, 0.0 }
 0x5fc   :  { %752 = vadd.xlane.f32.xlu0 %v751_v28 }
 0x5fe   :  { %v1200_v29 = vpop.eup %1199 }
 0x5ff   :  { %v1202_v30 = vpop.eup %1201  ;;  %v883_v31 = vsel %vm297_vm5, %v1200_v29, 0.0 }
 0x600   :  { %884 = vadd.xlane.f32.xlu1 %v883_v31  ;;  %v880_v32 = vsel %vm297_vm5, %v1202_v30, 0.0 }
 0x601   :  { %881 = vadd.xlane.f32.xlu0 %v880_v32 }
 0x611   :  { %892 = vrot.lane.b32.xlu1 %v1521_v45, %s1350_s1 }
 0x617   :  { %894 = vrot.lane.b32.xlu0 %v1517_v44, %s1350_s1 }
 0x683   :  { %v756_v33 = vpop.xlane.xlu1 %755 }
 0x684   :  { %1203 = vrcp.f32 %v756_v33 }
 0x685   :  { %v753_v27 = vpop.xlane.xlu0 %752 }
 0x686   :  { %1205 = vrcp.f32 %v753_v27 }
 0x689   :  { %v885_v34 = vpop.xlane.xlu1 %884 }
 0x68a   :  { %1207 = vrcp.f32 %v885_v34  ;;  %v882_v35 = vpop.xlane.xlu0 %881 }
 0x68b   :  { %1209 = vrcp.f32 %v882_v35 }
 0x68d   :  { %v893_v49 = vpop.permute.xlu1 %892 }
 0x68e   :  { %v895_v37 = vpop.permute.xlu0 %894 }
 0x68f   :  { %1153 = vmatprep.subr.mxu1 %v895_v37 }
 0x691   :  { %v1204_v36 = vpop.eup %1203 }
 0x692   :  { %v760_v40 = vmul.f32 %v1204_v36, %v1196_v26 }
 0x693   :  { %v1206_v38 = vpop.eup %1205 }
 0x694   :  { %v759_v42 = vmul.f32 %v1206_v38, %v1198_v20  ;;  %v762_v13 = vmul.f32 %v760_v40, %v1533_v48 }
 0x696   :  { %v761_v0 = vmul.f32 %v759_v42, %v1535_v51 }
 0x697   :  { %v1208_v45 = vpop.eup %1207 }
 0x698   :  { %v1210_v44 = vpop.eup %1209  ;;  %1150 = vmatprep.mubr.msk.f32.mxu1 %vm297_vm5, %v761_v0  ;;  %v889_v46 = vmul.f32 %v1208_v45, %v1200_v29 }
 0x699   :  { %1151 = vmatmul.mubr.msk.f32.vlgmr.msra.gmra.mxu1 %vm297_vm5, %v762_v13  ;;  %v888_v47 = vmul.f32 %v1210_v44, %v1202_v30 }
 0x69a   :  { %1154 = vmatpush3.msra.mxu1 %v895_v37  ;;  %v891_v52 = vmul.f32 %v889_v46, %v1533_v48 }
 0x69b   :  { %1155 = vmatprep.subr.mxu1 %v893_v49  ;;  %v890_v50 = vmul.f32 %v888_v47, %v1535_v51 }
 0x69c   :  { %1156 = vmatpush3.msra.mxu1 %v893_v49 }
 0x69d   :  { %1157 = vmatprep.mubr.msk.f32.mxu1 %vm297_vm5, %v890_v50 }
 0x69e   :  { %1158 = vmatmul.mubr.msk.f32.vlgmr.msra.gmra.mxu1 %vm297_vm5, %v891_v52 }
 0x759   :  { %v1152_v53 = vpop.f32.mrf.mxu1 }
 0x75a   :  { %845 = vst.msk [vmem:[#allocation2 + $0x8] sm:$0xff] %vm403_vm9, %v1152_v53 }
 0x75b   :  { %v835_v15 = vpop.f32.mrf.mxu1 }
 0x75c   :  { %844 = vst.msk [vmem:[#allocation2] sm:$0xff] %vm403_vm9, %v835_v15 }
 0x75e   :  { %v1159_v54 = vpop.f32.mrf.mxu1 }
 0x75f   :  { %983 = vrot.lane.b32.xlu0 %v1159_v54, %s1351_s25 }
 0x760   :  { %v970_v55 = vpop.f32.mrf.mxu1 }
 0x761   :  { %981 = vrot.lane.b32.xlu1 %v970_v55, %s1351_s25 }
 0x7d1   :  { %v984_v51 = vpop.permute.xlu0 %983 }
 0x7d2   :  { %988 = vst.msk [vmem:[#allocation2 + $0x8] sm:$0xff] %vm547_vm10, %v984_v51 }
 0x7d3   :  { %v982_v48 = vpop.permute.xlu1 %981 }
 0x7d4   :  { %987 = vst.msk [vmem:[#allocation2] sm:$0xff] %vm547_vm10, %v982_v48 }
 0x7d9   :  { %v990_v56 = vld [vmem:[#allocation2 + $0x8] sm:$0xff] }
 0x7da   :  { %v992_v23 = vadd.f32 %v1498_v39, %v990_v56 }
 0x7db   :  { %v989_v57 = vld [vmem:[#allocation2] sm:$0xff] }
 0x7dc   :  { %v991_v58 = vadd.f32 %v1498_v39, %v989_v57  ;;  %v996_v59 = vadd.f32 %v992_v23, %v1506_v43 }
 0x7de   :  { %v995_v60 = vadd.f32 %v991_v58, %v1501_v41  ;;  %998 = vst.msk [vmem:[#allocation12 + $0x8] sm:$0xff] %vm118_vm1, %v996_v59 }
 0x7e0   :  { %997 = vst.msk [vmem:[#allocation12] sm:$0xff] %vm118_vm1, %v995_v60 }
 0x7e1   :  { %1322 = shalt.err (!%p1319_p1)
}
 0x7e2   :  { %1010 = dma.vmem_to_hbm [thread:$0]  %s1005_s28, 256, %s1594_s7, [#allocation5], %s1341_s29, %s1341_s29, %s1342_s30  }
 0x7e3   :  { %1337 = dma.done.wait [#allocation5], 256  }
 0x7e4   :  { %1338 = vsyncadd [#allocation5], 4294967040 }
 0x7e5   :  { %1014 = vsyncpa [#allocation4], 1 }
 0x7e6   :  { %1015 = vsyncpa [#allocation7], 1 }
 0x7e7   :  { %1016 = vsyncpa [#allocation10], 1 }
 0x7e8   :  { %1017 = vsyncpa [#allocation5], 1 }

</bundles_post_ra>
